<compile_context>
chip_gen: v5e
topology: v5e:2x2
jax: 0.10.0
libtpu: 0.0.40
codegen_flags: <defaults>
</compile_context>

<pallas_src>
import jax
import jax.numpy as jnp
from jax.experimental import pallas as pl
from jax.experimental.pallas import tpu as pltpu

LANE = 128      # lane width
SUBLANE = 8     # f32 sublane width


def _round_up(x, m):
    return ((x + m - 1) // m) * m


def mlp_kernel(s_ref, c_ref, w1s_ref, w1c_ref, b1_ref,
               w2_ref, b2_ref, w3_ref, b3_ref, o_ref):
    # Block 1: Linear (concat folded into two matmuls) + ReLU, f32 accumulate.
    h = jnp.dot(s_ref[...], w1s_ref[...], preferred_element_type=jnp.float32)
    h = h + jnp.dot(c_ref[...], w1c_ref[...], preferred_element_type=jnp.float32)
    h = jnp.maximum(h + b1_ref[...], 0.0)
    # Block 2: Linear + ReLU (bf16 into MXU, f32 accumulate).
    h = jnp.dot(h.astype(w2_ref.dtype), w2_ref[...],
                preferred_element_type=jnp.float32)
    h = jnp.maximum(h + b2_ref[...], 0.0)
    # Block 3: Linear (norm='none', activation='none').
    y = jnp.dot(h.astype(w3_ref.dtype), w3_ref[...],
                preferred_element_type=jnp.float32)
    o_ref[...] = (y + b3_ref[...]).astype(o_ref.dtype)


def mlp_pallas(s, c, w1s, w1c, b1, w2, b2, w3, b3, *, block_b=128):
    """s, c: (n_pad, chw) bf16. Weights bf16 (in, out_padded); biases f32 (1, out_padded)."""
    n_pad, chw = s.shape
    dim_p = w1s.shape[1]
    out_p = w3.shape[1]
    tb = min(block_b, n_pad)
    assert n_pad % tb == 0 and tb % SUBLANE == 0
    grid = (n_pad // tb,)

    act_spec = lambda feat: pl.BlockSpec((tb, feat), lambda i: (i, 0))
    res_spec = lambda a: pl.BlockSpec(a.shape, lambda i: (0, 0))   # VMEM-resident

    # Cost estimate for the XLA scheduler.
    flops = 2 * n_pad * (2 * chw * dim_p + dim_p * dim_p + dim_p * out_p)
    param_bytes = sum(int(a.size) * a.dtype.itemsize
                      for a in (w1s, w1c, b1, w2, b2, w3, b3))
    bytes_accessed = (int(s.size) + int(c.size)) * s.dtype.itemsize \
        + param_bytes + n_pad * out_p * 4

    # Adaptive VMEM budget: resident params + double-buffered activation /
    # output tiles + f32 intermediates, with 2x headroom (floor 16 MiB, cap 96 MiB).
    act_tile_bytes = 2 * tb * (2 * chw) * 2          # double-buffered bf16 s & c tiles
    out_tile_bytes = 2 * tb * out_p * 4              # double-buffered f32 output tile
    inter_bytes = 2 * tb * dim_p * 4                 # f32 hidden intermediates
    vmem_bytes = 2 * (param_bytes + act_tile_bytes + out_tile_bytes + inter_bytes)
    vmem_bytes = min(max(vmem_bytes, 16 * 1024 * 1024), 96 * 1024 * 1024)

    return pl.pallas_call(
        mlp_kernel,
        out_shape=jax.ShapeDtypeStruct((n_pad, out_p), jnp.float32),
        grid=grid,
        in_specs=[act_spec(chw), act_spec(chw),
                  res_spec(w1s), res_spec(w1c), res_spec(b1),
                  res_spec(w2), res_spec(b2), res_spec(w3), res_spec(b3)],
        out_specs=pl.BlockSpec((tb, out_p), lambda i: (i, 0)),
        compiler_params=pltpu.CompilerParams(
            dimension_semantics=("parallel",),
            vmem_limit_bytes=vmem_bytes),
        cost_estimate=pl.CostEstimate(
            flops=flops, transcendentals=0, bytes_accessed=bytes_accessed),
    )(s, c, w1s, w1c, b1, w2, b2, w3, b3)


def prepare_params(params, chw):
    """Pad hidden/out dims to 128 lanes, split w1 into style/content halves,
    cast weights to bf16 (biases stay f32)."""
    w1, b1, w2, b2, w3, b3 = params
    in_dim, dim = w1.shape
    out_dim = w3.shape[1]
    assert in_dim == 2 * chw
    dim_p = _round_up(dim, LANE)
    out_p = _round_up(out_dim, LANE)

    pad2 = lambda a, r, cc: jnp.pad(a, ((0, r - a.shape[0]), (0, cc - a.shape[1])))
    w1p = pad2(w1, in_dim, dim_p)
    w1s, w1c = w1p[:chw], w1p[chw:]
    w2p = pad2(w2, dim_p, dim_p)
    w3p = pad2(w3, dim_p, out_p)
    b1p = pad2(b1, 1, dim_p)
    b2p = pad2(b2, 1, dim_p)
    b3p = pad2(b3, 1, out_p)

    bf = lambda a: a.astype(jnp.bfloat16)
    return (bf(w1s), bf(w1c), b1p, bf(w2p), b2p, bf(w3p), b3p)


def mlp_forward(style_vector, content_vector, packed_params, out_dim):
    """Reproduces MLP.forward: NCHW in, (n, c, 1, 1) out."""
    n, c, h, w = style_vector.shape
    chw = c * h * w
    s = style_vector.reshape(n, chw).astype(jnp.bfloat16)
    ct = content_vector.reshape(n, chw).astype(jnp.bfloat16)

    # Pad batch to a sublane/tile multiple (free zeros, sliced off below).
    tb = min(128, _round_up(n, SUBLANE))
    n_pad = _round_up(n, tb)
    if n_pad != n:
        s = jnp.pad(s, ((0, n_pad - n), (0, 0)))
        ct = jnp.pad(ct, ((0, n_pad - n), (0, 0)))

    y = mlp_pallas(s, ct, *packed_params, block_b=tb)   # (n_pad, out_p) f32
    return y[:n, :out_dim].reshape(n, c, 1, 1)


def init_params(key, in_dim, dim, out_dim):
    """Deterministic synthetic parameters (Linear weight (in,out), bias (1,out))."""
    ks = jax.random.split(key, 6)
    scale = 0.05
    w1 = scale * jax.random.normal(ks[0], (in_dim, dim), jnp.float32)
    b1 = scale * jax.random.normal(ks[1], (1, dim), jnp.float32)
    w2 = scale * jax.random.normal(ks[2], (dim, dim), jnp.float32)
    b2 = scale * jax.random.normal(ks[3], (1, dim), jnp.float32)
    w3 = scale * jax.random.normal(ks[4], (dim, out_dim), jnp.float32)
    b3 = scale * jax.random.normal(ks[5], (1, out_dim), jnp.float32)
    return (w1, b1, w2, b2, w3, b3)


if __name__ == "__main__":
    # Small shapes consistent with the module's forward:
    # n=2, c=4, h=w=4  ->  in_dim = 2*c*h*w = 128, out_dim = c = 4, dim = 32, n_blk = 3
    n, c, h, w = 2, 4, 4, 4
    chw = c * h * w
    in_dim = 2 * chw
    dim = 32
    out_dim = c

    key = jax.random.PRNGKey(0)
    k_s, k_c, k_p = jax.random.split(key, 3)
    style = jax.random.normal(k_s, (n, c, h, w), jnp.float32)
    content = jax.random.normal(k_c, (n, c, h, w), jnp.float32)
    params = init_params(k_p, in_dim, dim, out_dim)
    packed = prepare_params(params, chw)

    out = mlp_forward(style, content, packed, out_dim)
    out = jax.block_until_ready(out)
    assert out.shape == (n, c, 1, 1), out.shape

    # Reference 1: pure-JAX with the same bf16-input / f32-accumulate path.
    w1s, w1c, b1p, w2p, b2p, w3p, b3p = packed
    sf = style.reshape(n, chw).astype(jnp.bfloat16)
    cf = content.reshape(n, chw).astype(jnp.bfloat16)
    hh = jnp.dot(sf, w1s, preferred_element_type=jnp.float32) \
        + jnp.dot(cf, w1c, preferred_element_type=jnp.float32) + b1p
    hh = jnp.maximum(hh, 0.0)
    hh = jnp.dot(hh.astype(jnp.bfloat16), w2p, preferred_element_type=jnp.float32) + b2p
    hh = jnp.maximum(hh, 0.0)
    yy = jnp.dot(hh.astype(jnp.bfloat16), w3p, preferred_element_type=jnp.float32) + b3p
    ref_bf16 = yy[:, :out_dim].reshape(n, c, 1, 1)
    assert jnp.allclose(out, ref_bf16, atol=1e-3, rtol=1e-3)

    # Reference 2: full-f32 module semantics (loose tolerance for bf16 weights).
    x = jnp.concatenate([style, content], axis=1).reshape(n, -1)
    w1, b1, w2, b2, w3, b3 = params
    ref = jnp.maximum(x @ w1 + b1, 0.0)
    ref = jnp.maximum(ref @ w2 + b2, 0.0)
    ref = (ref @ w3 + b3).reshape(n, c, 1, 1)
    assert jnp.allclose(out, ref, atol=5e-2, rtol=5e-2)

    print("KERNEL_OK")
</pallas_src>

<mosaic_0001>
module attributes {stable_mosaic.version = 11 : i64} {
  func.func @mlp_kernel(%arg0: i32, %arg1: memref<8x64xbf16, #tpu.memory_space<vmem>>, %arg2: memref<8x64xbf16, #tpu.memory_space<vmem>>, %arg3: memref<64x128xbf16, #tpu.memory_space<vmem>>, %arg4: memref<64x128xbf16, #tpu.memory_space<vmem>>, %arg5: memref<1x128xf32, #tpu.memory_space<vmem>>, %arg6: memref<128x128xbf16, #tpu.memory_space<vmem>>, %arg7: memref<1x128xf32, #tpu.memory_space<vmem>>, %arg8: memref<128x128xbf16, #tpu.memory_space<vmem>>, %arg9: memref<1x128xf32, #tpu.memory_space<vmem>>, %arg10: memref<8x128xf32, #tpu.memory_space<vmem>>) attributes {dimension_semantics = [#tpu.dimension_semantics<parallel>], iteration_bounds = array<i64: 1>, scalar_prefetch = 0 : i64, scratch_operands = 0 : i64, tpu.core_type = #tpu.core_type<tc>, window_params = [{transform_indices = @transform_0, window_bounds = array<i64: 8, 64>}, {transform_indices = @transform_1, window_bounds = array<i64: 8, 64>}, {pipeline_mode = #tpu.pipeline_mode<synchronous>, transform_indices = @transform_2, window_bounds = array<i64: 64, 128>}, {pipeline_mode = #tpu.pipeline_mode<synchronous>, transform_indices = @transform_3, window_bounds = array<i64: 64, 128>}, {pipeline_mode = #tpu.pipeline_mode<synchronous>, transform_indices = @transform_4, window_bounds = array<i64: 1, 128>}, {pipeline_mode = #tpu.pipeline_mode<synchronous>, transform_indices = @transform_5, window_bounds = array<i64: 128, 128>}, {pipeline_mode = #tpu.pipeline_mode<synchronous>, transform_indices = @transform_6, window_bounds = array<i64: 1, 128>}, {pipeline_mode = #tpu.pipeline_mode<synchronous>, transform_indices = @transform_7, window_bounds = array<i64: 128, 128>}, {pipeline_mode = #tpu.pipeline_mode<synchronous>, transform_indices = @transform_8, window_bounds = array<i64: 1, 128>}, {transform_indices = @transform_9, window_bounds = array<i64: 8, 128>}]} {
    %c0 = arith.constant 0 : index
    %c0_0 = arith.constant 0 : index
    %0 = vector.load %arg1[%c0, %c0_0] : memref<8x64xbf16, #tpu.memory_space<vmem>>, vector<8x64xbf16>
    %c0_1 = arith.constant 0 : index
    %c0_2 = arith.constant 0 : index
    %1 = vector.load %arg3[%c0_1, %c0_2] : memref<64x128xbf16, #tpu.memory_space<vmem>>, vector<64x128xbf16>
    %cst = arith.constant dense<0.000000e+00> : vector<8x128xf32>
    %2 = tpu.matmul %0, %1, %cst {dimension_numbers = #tpu.dot_dimension_numbers<[1], [0], [0], [1], [0, 0, 1, 1], [], []>} : vector<8x64xbf16>, vector<64x128xbf16>, vector<8x128xf32> -> vector<8x128xf32>
    %c0_3 = arith.constant 0 : index
    %c0_4 = arith.constant 0 : index
    %3 = vector.load %arg2[%c0_3, %c0_4] : memref<8x64xbf16, #tpu.memory_space<vmem>>, vector<8x64xbf16>
    %c0_5 = arith.constant 0 : index
    %c0_6 = arith.constant 0 : index
    %4 = vector.load %arg4[%c0_5, %c0_6] : memref<64x128xbf16, #tpu.memory_space<vmem>>, vector<64x128xbf16>
    %cst_7 = arith.constant dense<0.000000e+00> : vector<8x128xf32>
    %5 = tpu.matmul %3, %4, %cst_7 {dimension_numbers = #tpu.dot_dimension_numbers<[1], [0], [0], [1], [0, 0, 1, 1], [], []>} : vector<8x64xbf16>, vector<64x128xbf16>, vector<8x128xf32> -> vector<8x128xf32>
    %6 = arith.addf %2, %5 : vector<8x128xf32>
    %c0_8 = arith.constant 0 : index
    %c0_9 = arith.constant 0 : index
    %7 = vector.load %arg5[%c0_8, %c0_9] : memref<1x128xf32, #tpu.memory_space<vmem>>, vector<1x128xf32>
    %8 = vector.broadcast %7 : vector<1x128xf32> to vector<8x128xf32>
    %9 = arith.addf %6, %8 : vector<8x128xf32>
    %cst_10 = arith.constant 0.000000e+00 : f32
    %10 = vector.broadcast %cst_10 : f32 to vector<8x128xf32>
    %11 = arith.maximumf %9, %10 : vector<8x128xf32>
    %12 = arith.truncf %11 : vector<8x128xf32> to vector<8x128xbf16>
    %c0_11 = arith.constant 0 : index
    %c0_12 = arith.constant 0 : index
    %13 = vector.load %arg6[%c0_11, %c0_12] : memref<128x128xbf16, #tpu.memory_space<vmem>>, vector<128x128xbf16>
    %cst_13 = arith.constant dense<0.000000e+00> : vector<8x128xf32>
    %14 = tpu.matmul %12, %13, %cst_13 {dimension_numbers = #tpu.dot_dimension_numbers<[1], [0], [0], [1], [0, 0, 1, 1], [], []>} : vector<8x128xbf16>, vector<128x128xbf16>, vector<8x128xf32> -> vector<8x128xf32>
    %c0_14 = arith.constant 0 : index
    %c0_15 = arith.constant 0 : index
    %15 = vector.load %arg7[%c0_14, %c0_15] : memref<1x128xf32, #tpu.memory_space<vmem>>, vector<1x128xf32>
    %16 = vector.broadcast %15 : vector<1x128xf32> to vector<8x128xf32>
    %17 = arith.addf %14, %16 : vector<8x128xf32>
    %cst_16 = arith.constant 0.000000e+00 : f32
    %18 = vector.broadcast %cst_16 : f32 to vector<8x128xf32>
    %19 = arith.maximumf %17, %18 : vector<8x128xf32>
    %20 = arith.truncf %19 : vector<8x128xf32> to vector<8x128xbf16>
    %c0_17 = arith.constant 0 : index
    %c0_18 = arith.constant 0 : index
    %21 = vector.load %arg8[%c0_17, %c0_18] : memref<128x128xbf16, #tpu.memory_space<vmem>>, vector<128x128xbf16>
    %cst_19 = arith.constant dense<0.000000e+00> : vector<8x128xf32>
    %22 = tpu.matmul %20, %21, %cst_19 {dimension_numbers = #tpu.dot_dimension_numbers<[1], [0], [0], [1], [0, 0, 1, 1], [], []>} : vector<8x128xbf16>, vector<128x128xbf16>, vector<8x128xf32> -> vector<8x128xf32>
    %c0_20 = arith.constant 0 : index
    %c0_21 = arith.constant 0 : index
    %23 = vector.load %arg9[%c0_20, %c0_21] : memref<1x128xf32, #tpu.memory_space<vmem>>, vector<1x128xf32>
    %24 = vector.broadcast %23 : vector<1x128xf32> to vector<8x128xf32>
    %25 = arith.addf %22, %24 : vector<8x128xf32>
    %c0_22 = arith.constant 0 : index
    %c0_23 = arith.constant 0 : index
    %26 = vector.load %arg10[%c0_22, %c0_23] : memref<8x128xf32, #tpu.memory_space<vmem>>, vector<8x128xf32>
    tpu.vector_store %arg10[%c0_22, %c0_23], %25 {strides = array<i32>} : memref<8x128xf32, #tpu.memory_space<vmem>>, vector<8x128xf32>,
    return
  }
  func.func @transform_0(%arg0: i32) -> (i32, i32) {
    %c0_i32 = arith.constant 0 : i32
    %c0_i32_0 = arith.constant 0 : i32
    return %arg0, %c0_i32 : i32, i32
  }
  func.func @transform_1(%arg0: i32) -> (i32, i32) {
    %c0_i32 = arith.constant 0 : i32
    %c0_i32_0 = arith.constant 0 : i32
    return %arg0, %c0_i32 : i32, i32
  }
  func.func @transform_2(%arg0: i32) -> (i32, i32) {
    %c0_i32 = arith.constant 0 : i32
    %c0_i32_0 = arith.constant 0 : i32
    %c0_i32_1 = arith.constant 0 : i32
    return %c0_i32, %c0_i32_0 : i32, i32
  }
  func.func @transform_3(%arg0: i32) -> (i32, i32) {
    %c0_i32 = arith.constant 0 : i32
    %c0_i32_0 = arith.constant 0 : i32
    %c0_i32_1 = arith.constant 0 : i32
    return %c0_i32, %c0_i32_0 : i32, i32
  }
  func.func @transform_4(%arg0: i32) -> (i32, i32) {
    %c0_i32 = arith.constant 0 : i32
    %c0_i32_0 = arith.constant 0 : i32
    %c0_i32_1 = arith.constant 0 : i32
    return %c0_i32, %c0_i32_0 : i32, i32
  }
  func.func @transform_5(%arg0: i32) -> (i32, i32) {
    %c0_i32 = arith.constant 0 : i32
    %c0_i32_0 = arith.constant 0 : i32
    %c0_i32_1 = arith.constant 0 : i32
    return %c0_i32, %c0_i32_0 : i32, i32
  }
  func.func @transform_6(%arg0: i32) -> (i32, i32) {
    %c0_i32 = arith.constant 0 : i32
    %c0_i32_0 = arith.constant 0 : i32
    %c0_i32_1 = arith.constant 0 : i32
    return %c0_i32, %c0_i32_0 : i32, i32
  }
  func.func @transform_7(%arg0: i32) -> (i32, i32) {
    %c0_i32 = arith.constant 0 : i32
    %c0_i32_0 = arith.constant 0 : i32
    %c0_i32_1 = arith.constant 0 : i32
    return %c0_i32, %c0_i32_0 : i32, i32
  }
  func.func @transform_8(%arg0: i32) -> (i32, i32) {
    %c0_i32 = arith.constant 0 : i32
    %c0_i32_0 = arith.constant 0 : i32
    %c0_i32_1 = arith.constant 0 : i32
    return %c0_i32, %c0_i32_0 : i32, i32
  }
  func.func @transform_9(%arg0: i32) -> (i32, i32) {
    %c0_i32 = arith.constant 0 : i32
    %c0_i32_0 = arith.constant 0 : i32
    return %arg0, %c0_i32 : i32, i32
  }
}

</mosaic_0001>

<bundles_post_ra>
// kernel: tpu_custom_call.1
= control target key start
LH: loop header
LB: loop body
LE: loop exit
PB: predicated region body
PF: predicated region fallthrough
CT: control target
= control target key end

     0   :  { %14 = vsyncpa [#allocation3], 0  ;;  %s816_s0 = inlined_call_operand.hbm [shape: bf16[8,64], index: 0, kind: input, shape index: {}]   ;;  %s817_s1 = inlined_call_operand.hbm [shape: bf16[8,64], index: 1, kind: input, shape index: {}]   ;;  %s818_s2 = inlined_call_operand.hbm [shape: bf16[64,128], index: 2, kind: input, shape index: {}]   ;;  %s819_s3 = inlined_call_operand.hbm [shape: bf16[64,128], index: 3, kind: input, shape index: {}]   ;;  %s820_s4 = inlined_call_operand.vmem [shape: f32[1,128], index: 4, kind: input, shape index: {}]   ;;  %s821_s5 = inlined_call_operand.hbm [shape: bf16[128,128], index: 5, kind: input, shape index: {}]   ;;  %s822_s6 = inlined_call_operand.vmem [shape: f32[1,128], index: 6, kind: input, shape index: {}]   ;;  %s823_s7 = inlined_call_operand.hbm [shape: bf16[128,128], index: 7, kind: input, shape index: {}]   ;;  %s824_s8 = inlined_call_operand.vmem [shape: f32[1,128], index: 8, kind: input, shape index: {}]   ;;  %s825_s9 = inlined_call_operand.hbm [shape: f32[8,128], index: 9, kind: output, shape index: {}]  }
   0x1   :  { %15 = vsyncpa [#allocation6], 0 }
   0x2   :  { %16 = vsyncpa [#allocation9], 0 }
   0x3   :  { %17 = vsyncpa [#allocation12], 0  ;;  %s35_s11 = sshll.u32 %s817_s1, 4  ;;  %s36_s11 = int_to_ptr.hbm [resolvable:$true] %s35_s11 }
   0x4   :  { %18 = vsyncpa [#allocation4], 0  ;;  %s727_s12 = smov [#allocation5]   ;;  %s58_s16 = sshll.u32 %s819_s3, 4  ;;  %s59_s16 = int_to_ptr.hbm [resolvable:$true] %s58_s16 }
   0x5   :  { %s37_s13 = sshll.u32 %s727_s12, 4  ;;  %s728_s17 = smov [#allocation8]   ;;  %s38_s13 = int_to_ptr.vmem [resolvable:$true] %s37_s13 }
   0x6   :  { %40 = dma.hbm_to_vmem [thread:$0]  %s36_s11, 64, %s38_s13, [#allocation6]  }
   0x7   :  { %s60_s18 = sshll.u32 %s728_s17, 4  ;;  %s24_s21 = sshll.u32 %s816_s0, 4  ;;  %s61_s18 = int_to_ptr.vmem [resolvable:$true] %s60_s18  ;;  %s25_s21 = int_to_ptr.hbm [resolvable:$true] %s24_s21 }
   0x8   :  { %s729_s1 = smov 64   ;;  %s730_s22 = smov 4  }
   0x9   :  { %66 = dma.hbm_to_vmem [thread:$0]  %s59_s16, 512, %s61_s18, [#allocation9], %s729_s1, %s729_s1, %s730_s22  }
   0xa   :  { %s45_s25 = sshll.u32 %s818_s2, 4  ;;  %s731_s26 = smov [#allocation2]   ;;  %s46_s25 = int_to_ptr.hbm [resolvable:$true] %s45_s25 }
   0xb   :  { %s26_s27 = sshll.u32 %s731_s26, 4  ;;  %s732_s3 = smov [#allocation7]   ;;  %s27_s27 = int_to_ptr.vmem [resolvable:$true] %s26_s27 }
   0xc   :  { %29 = dma.hbm_to_vmem [thread:$0]  %s25_s21, 64, %s27_s27, [#allocation3]  }
   0xd   :  { %s47_s28 = sshll.u32 %s732_s3, 4  ;;  %s73_s0 = sshll.u32 %s821_s5, 4  ;;  %s48_s28 = int_to_ptr.vmem [resolvable:$true] %s47_s28  ;;  %s74_s0 = int_to_ptr.hbm [resolvable:$true] %s73_s0 }
   0xe   :  { %53 = dma.hbm_to_vmem [thread:$0]  %s46_s25, 512, %s48_s28, [#allocation6], %s729_s1, %s729_s1, %s730_s22  }
   0xf   :  { %s88_s12 = sshll.u32 %s823_s7, 4  ;;  %s733_s13 = smov [#allocation10]   ;;  %s89_s12 = int_to_ptr.hbm [resolvable:$true] %s88_s12 }
  0x10   :  { %s75_s2 = sshll.u32 %s733_s13, 4  ;;  %s734_s14 = smov [#allocation11]   ;;  %s76_s2 = int_to_ptr.vmem [resolvable:$true] %s75_s2 }
  0x11   :  { %81 = dma.hbm_to_vmem [thread:$0]  %s74_s0, 1024, %s76_s2, [#allocation9], %s729_s1, %s729_s1, %s730_s22  }
  0x12   :  { %s90_s15 = sshll.u32 %s734_s14, 4  ;;  %s91_s15 = int_to_ptr.vmem [resolvable:$true] %s90_s15 }
  0x13   :  { %96 = dma.hbm_to_vmem [thread:$0]  %s89_s12, 1024, %s91_s15, [#allocation12], %s729_s1, %s729_s1, %s730_s22  }
  0x14   :  { %717 = dma.done.wait [#allocation3], 64  }
  0x15   :  { %718 = vsyncadd [#allocation3], 4294967232 }
  0x16   :  { %719 = dma.done.wait [#allocation6], 576  }
  0x17   :  { %720 = vsyncadd [#allocation6], 4294966720 }
  0x18   :  { %721 = dma.done.wait [#allocation9], 1536  }
  0x19   :  { %722 = vsyncadd [#allocation9], 4294965760 }
  0x1a   :  { %723 = dma.done.wait [#allocation12], 1024  }
  0x1b   :  { %724 = vsyncadd [#allocation12], 4294966272  ;;  %v520_v0 = vld [vmem:[#allocation8 + $0x18] sm:$0xff]  ;;  %v519_v2 = vld [vmem:[#allocation8 + $0x10] sm:$0xff]  ;;  %vm166_vm0 = vcmask 523264   ;;  %s735_s19 = smov [#allocation13]  }
  0x1c   :  { %v516_v1 = vld [vmem:[#allocation7 + $0x18] sm:$0xff]  ;;  %174 = vmatpush.bf16.msra.mxu0 %v520_v0  ;;  %v515_v3 = vld [vmem:[#allocation7 + $0x10] sm:$0xff]  ;;  %v518_v6 = vld [vmem:[#allocation8 + $0x8] sm:$0xff]  ;;  %s400_s20 = sshll.u32 %s735_s19, 4  ;;  %s402_s22 = sshll.u32 %s825_s9, 4  ;;  %s401_s20 = int_to_ptr.vmem [resolvable:$true] %s400_s20  ;;  %s403_s22 = int_to_ptr.hbm [resolvable:$true] %s402_s22 }
  0x1d   :  { %214 = vmatpush.bf16.msra.mxu1 %v516_v1  ;;  %v528_v4 = vld [vmem:[#allocation10 + $0x38] sm:$0xff]  ;;  %v527_v5 = vld [vmem:[#allocation10 + $0x30] sm:$0xff]  ;;  %v514_v7 = vld [vmem:[#allocation7 + $0x8] sm:$0xff] }
  0x1e   :  { %298 = vmatpush.bf16.msra.mxu2 %v528_v4  ;;  %v526_v8 = vld [vmem:[#allocation10 + $0x28] sm:$0xff]  ;;  %v517_v9 = vld [vmem:[#allocation8] sm:$0xff]  ;;  %v133_v11 = vld [vmem:[#allocation5] sm:$0xf] }
  0x1f   :  { %v513_v10 = vld [vmem:[#allocation7] sm:$0xff]  ;;  %v124_v12 = vld [vmem:[#allocation2] sm:$0xf]  ;;  %v523_v15 = vld [vmem:[#allocation10 + $0x10] sm:$0xff] }
  0x20   :  { %175 = vmatpush.bf16.msra.mxu0 %v519_v2  ;;  %v525_v13 = vld [vmem:[#allocation10 + $0x20] sm:$0xff]  ;;  %v524_v14 = vld [vmem:[#allocation10 + $0x18] sm:$0xff]  ;;  %v522_v16 = vld [vmem:[#allocation10 + $0x8] sm:$0xff] }
  0x21   :  { %215 = vmatpush.bf16.msra.mxu1 %v515_v3  ;;  %v521_v17 = vld [vmem:[#allocation10] sm:$0xff]  ;;  %v536_v18 = vld [vmem:[#allocation11 + $0x38] sm:$0xff]  ;;  %v535_v19 = vld [vmem:[#allocation11 + $0x30] sm:$0xff] }
  0x22   :  { %299 = vmatpush.bf16.msra.mxu2 %v527_v5  ;;  %381 = vmatpush.bf16.msra.mxu3 %v536_v18  ;;  %v534_v20 = vld [vmem:[#allocation11 + $0x28] sm:$0xff]  ;;  %v533_v21 = vld [vmem:[#allocation11 + $0x20] sm:$0xff]  ;;  %v532_v22 = vld [vmem:[#allocation11 + $0x18] sm:$0xff] }
  0x23   :  { %v531_v23 = vld [vmem:[#allocation11 + $0x10] sm:$0xff]  ;;  %v546_v24 = vld [vmem:[%s820_s4] ss:$0 sm:$0xff]  ;;  %v530_v33 = vld [vmem:[#allocation11 + $0x8] sm:$0xff] }
  0x24   :  { %176 = vmatpush.bf16.msra.mxu0 %v518_v6  ;;  %v529_v34 = vld [vmem:[#allocation11] sm:$0xff]  ;;  %v547_v35 = vld [vmem:[%s822_s6] ss:$0 sm:$0xff] }
  0x25   :  { %216 = vmatpush.bf16.msra.mxu1 %v514_v7  ;;  %v548_v41 = vld [vmem:[%s824_s8] ss:$0 sm:$0xff] }
  0x26   :  { %300 = vmatpush.bf16.msra.mxu2 %v526_v8  ;;  %382 = vmatpush.bf16.msra.mxu3 %v535_v19 }
  0x28   :  { %177 = vmatpush.bf16.msra.mxu0 %v517_v9 }
  0x29   :  { %217 = vmatpush.bf16.msra.mxu1 %v513_v10 }
  0x2a   :  { %301 = vmatpush.bf16.msra.mxu2 %v525_v13  ;;  %383 = vmatpush.bf16.msra.mxu3 %v534_v20 }
  0x2b   :  { %431 = vmatmul.msk.bf16.vlgmr.msra.gmra.mxu0 %vm166_vm0, %v133_v11 }
  0x2c   :  { %448 = vmatmul.msk.bf16.vlgmr.msra.gmra.mxu1 %vm166_vm0, %v124_v12 }
  0x2e   :  { %302 = vmatpush.bf16.msra.mxu2 %v524_v14  ;;  %384 = vmatpush.bf16.msra.mxu3 %v533_v21 }
  0x32   :  { %303 = vmatpush.bf16.msra.mxu2 %v523_v15  ;;  %385 = vmatpush.bf16.msra.mxu3 %v532_v22 }
  0x36   :  { %304 = vmatpush.bf16.msra.mxu2 %v522_v16  ;;  %386 = vmatpush.bf16.msra.mxu3 %v531_v23 }
  0x3a   :  { %305 = vmatpush.bf16.msra.mxu2 %v521_v17  ;;  %387 = vmatpush.bf16.msra.mxu3 %v530_v33 }
  0x3e   :  { %388 = vmatpush.bf16.msra.mxu3 %v529_v34 }
  0xa8   :  { %v179_v25 = vpop.f32.mrf.mxu0 }
  0xa9   :  { %v219_v26 = vpop.f32.mrf.mxu1 }
  0xaa   :  { %v220_v27 = vadd.f32 %v219_v26, %v179_v25 }
  0xac   :  { %v227_v28 = vadd.f32 %v546_v24, %v220_v27 }
  0xae   :  { %v228_v29 = vmax.f32 %v227_v28, 0.0 }
  0xb0   :  { %v229_v30 = vpack.c.bf16 %v228_v29, %v228_v29  ;;  %v181_v31 = vpop.f32.mrf.mxu0 }
  0xb1   :  { %v221_v32 = vpop.f32.mrf.mxu1 }
  0xb2   :  { %306 = vmatmul.bf16.vlgmr.msra.gmra.mxu2 %v229_v30 }
 0x135   :  { %v307_v36 = vpop.f32.mrf.mxu2 }
 0x136   :  { %v308_v37 = vadd.f32 %v547_v35, %v307_v36 }
 0x138   :  { %v311_v38 = vmax.f32 %v308_v37, 0.0 }
 0x13a   :  { %v312_v39 = vpack.c.bf16 %v311_v38, %v311_v38 }
 0x13c   :  { %389 = vmatmul.bf16.vlgmr.msra.gmra.mxu3 %v312_v39 }
 0x13d   :  { %v309_v40 = vpop.f32.mrf.mxu2 }
 0x1bf   :  { %v390_v42 = vpop.f32.mrf.mxu3 }
 0x1c0   :  { %v391_v43 = vadd.f32 %v548_v41, %v390_v42 }
 0x1c2   :  { %394 = vst [vmem:[#allocation13] sm:$0xff] %v391_v43 }
 0x1c3   :  { %405 = dma.vmem_to_hbm [thread:$0]  %s401_s20, 128, %s403_s22, [#allocation4]  }
 0x1c7   :  { %v392_v44 = vpop.f32.mrf.mxu3 }
 0x1c8   :  { %725 = dma.done.wait [#allocation4], 128  }
 0x1c9   :  { %726 = vsyncadd [#allocation4], 4294967168 }
 0x1ca   :  { %410 = vsyncpa [#allocation3], 1 }
 0x1cb   :  { %411 = vsyncpa [#allocation6], 1 }
 0x1cc   :  { %412 = vsyncpa [#allocation9], 1 }
 0x1cd   :  { %413 = vsyncpa [#allocation12], 1 }
 0x1ce   :  { %414 = vsyncpa [#allocation4], 1 }

</bundles_post_ra>
